<compile_context>
chip_gen: v5e
topology: v5e:2x2
jax: 0.10.0
libtpu: 0.0.40
codegen_flags: <defaults>
</compile_context>

<pallas_src>
import functools

import jax
import jax.numpy as jnp
from jax.experimental import pallas as pl
from jax.experimental.pallas import tpu as pltpu


# ----------------------------------------------------------------------------
# Buffer setup (mirrors PositionalEncoding.__init__); kept in float32 once.
# ----------------------------------------------------------------------------
def make_positional_encoding_table(hidden_dim, max_len=5000):
    """Returns pe of shape (max_len, 1, hidden_dim), float32 (the torch buffer)."""
    position = jnp.arange(0, max_len, dtype=jnp.float32)[:, None]            # (L, 1)
    div_term = jnp.exp(
        jnp.arange(0, hidden_dim, 2, dtype=jnp.float32)
        * (-jnp.log(jnp.float32(10000.0)) / hidden_dim)
    )                                                                         # (H/2,)
    pe = jnp.zeros((max_len, hidden_dim), dtype=jnp.float32)
    pe = pe.at[:, 0::2].set(jnp.sin(position * div_term))
    pe = pe.at[:, 1::2].set(jnp.cos(position * div_term))
    return pe[:, None, :]                                                     # (L, 1, H)


# ----------------------------------------------------------------------------
# Kernels
# ----------------------------------------------------------------------------
def _pe_block_f32(pe_ref, x_shape):
    """Return the f32 pe block shaped so it broadcasts/aligns with the x block."""
    pe = pe_ref[...].astype(jnp.float32)
    if len(x_shape) == 3:
        # 3-D path: pe block is (ts, 1, H); broadcasts over the batch sublane dim.
        return pe
    # Flat path: pe block is (ts, H); replicate along lanes to (ts, B*H).
    n_rep = x_shape[-1] // pe.shape[-1]
    return pe if n_rep == 1 else jnp.concatenate([pe] * n_rep, axis=-1)


def _pe_add_kernel(x_ref, pe_ref, o_ref):
    y = x_ref[...].astype(jnp.float32) + _pe_block_f32(pe_ref, x_ref.shape)
    o_ref[...] = y.astype(o_ref.dtype)


def _pe_add_dropout_prng_kernel(x_ref, pe_ref, seed_ref, o_ref, *, keep_thresh, scale):
    # Per-tile seeding so every grid step / megacore shard gets an independent mask.
    pltpu.prng_seed(seed_ref[0], pl.program_id(0), pl.program_id(1))
    y = x_ref[...].astype(jnp.float32) + _pe_block_f32(pe_ref, x_ref.shape)
    bits = pltpu.bitcast(pltpu.prng_random_bits(y.shape), jnp.uint32)
    keep = bits >= jnp.uint32(keep_thresh)          # P(drop) = keep_thresh / 2^32 ~= p
    o_ref[...] = jnp.where(keep, y * jnp.float32(scale), 0.0).astype(o_ref.dtype)


def _pe_add_dropout_uniform_kernel(x_ref, pe_ref, u_ref, o_ref, *, p, scale):
    # Fallback for non-TPU backends (interpret mode): uniforms are streamed in.
    y = x_ref[...].astype(jnp.float32) + _pe_block_f32(pe_ref, x_ref.shape)
    keep = u_ref[...] >= jnp.float32(p)
    o_ref[...] = jnp.where(keep, y * jnp.float32(scale), 0.0).astype(o_ref.dtype)


# ----------------------------------------------------------------------------
# Tiling / VMEM policy
# ----------------------------------------------------------------------------
_MIN_GRID_STEPS = 8                      # keep the pipeline / megacore fed
_BLOCK_BYTES_TARGET = 2 * 1024 * 1024    # ~2 MiB of streamed bytes per grid step


def _vmem_limit_bytes():
    try:
        cap = pltpu.get_tpu_info().vmem_capacity_bytes   # 128 MiB v5e/v6e, 64 MiB v7x
    except Exception:
        cap = 64 * 1024 * 1024                           # conservative default
    return int(min(cap // 2, 64 * 1024 * 1024))


def _sublane(itemsize):
    return max(8, 32 // itemsize)        # 8 f32, 16 bf16, 32 int8/fp8


def _pick_ts(S, row_bytes, sub):
    """Largest seq tile bounded by the bytes target and by S/_MIN_GRID_STEPS."""
    ts = min(max(1, _BLOCK_BYTES_TARGET // max(row_bytes, 1)),
             max(1, pl.cdiv(S, _MIN_GRID_STEPS)))
    if ts >= S:
        return S
    return min(S, max(sub, (ts // sub) * sub))


# ----------------------------------------------------------------------------
# Wrapper (the module forward)
# ----------------------------------------------------------------------------
def positional_encoding(x, pe_table, *, p: float = 0.1,
                        training: bool = False, seed: int = 0):
    """x: (S, B, H).  pe_table: (max_len, 1, H) or (max_len, H), float32."""
    S, B, H = x.shape
    itemsize = x.dtype.itemsize
    sub = _sublane(itemsize)

    pe_src = pe_table.reshape(pe_table.shape[0], pe_table.shape[-1])   # (L, H)
    if pe_src.dtype != jnp.float32:
        pe_src = pe_src.astype(jnp.float32)

    if training and p >= 1.0:
        return jnp.zeros((S, B, H), x.dtype)   # nn.Dropout(p=1) zeroes everything
    use_dropout = training and p > 0.0
    use_hw_prng = use_dropout and jax.default_backend() == "tpu"
    extra_u = use_dropout and not use_hw_prng             # streamed f32 uniforms
    stream_bytes = 2 * itemsize + (4 if extra_u else 0)   # x + out (+ uniforms) / elem

    # Layout: flatten to (S, B*H) when H is lane-ragged or B is small (dense
    # sublanes, widest possible lanes); otherwise keep 3-D and tile batch.
    flat = ((H % 128 != 0) or (B < 8)) and B <= 32
    if flat and sub * B * H * stream_bytes > 4 * _BLOCK_BYTES_TARGET:
        flat = False   # huge B*H rows: use the batch-tiled 3-D path instead

    if flat:
        C = B * H
        x_in = x.reshape(S, C)
        pe_in = pe_src[:S]                                   # (S, H) f32
        row_bytes = C * stream_bytes + H * 4
        ts = _pick_ts(S, row_bytes, sub)
        blk = (ts, C)
        x_spec = pl.BlockSpec(blk, lambda i, j: (i, 0))
        pe_spec = pl.BlockSpec((ts, H), lambda i, j: (i, 0))
        out_struct = jax.ShapeDtypeStruct((S, C), x.dtype)
        grid = (pl.cdiv(S, ts), 1)
    else:
        x_in = x
        pe_in = pe_src[:S][:, None, :]                       # (S, 1, H) f32
        tb = B
        if B > sub and sub * B * H * stream_bytes > _BLOCK_BYTES_TARGET:
            tb = _BLOCK_BYTES_TARGET // max(sub * H * stream_bytes, 1)
            tb = min(B, max(sub, (tb // sub) * sub))
        row_bytes = tb * H * stream_bytes + H * 4
        ts = _pick_ts(S, row_bytes, sub)
        blk = (ts, tb, H)
        x_spec = pl.BlockSpec(blk, lambda i, j: (i, j, 0))
        pe_spec = pl.BlockSpec((ts, 1, H), lambda i, j: (i, 0, 0))
        out_struct = jax.ShapeDtypeStruct((S, B, H), x.dtype)
        grid = (pl.cdiv(S, ts), pl.cdiv(B, tb))

    cparams = pltpu.CompilerParams(
        dimension_semantics=("parallel", "parallel"),   # v7x: shard over both TCs
        vmem_limit_bytes=_vmem_limit_bytes(),
    )

    if not use_dropout:
        out = pl.pallas_call(
            _pe_add_kernel,
            out_shape=out_struct,
            grid=grid,
            in_specs=[x_spec, pe_spec],
            out_specs=x_spec,
            compiler_params=cparams,
        )(x_in, pe_in)
        return out.reshape(S, B, H)

    scale = 1.0 / (1.0 - p)
    if use_hw_prng:
        # Real TPU: hardware PRNG, no extra HBM stream for the mask.
        keep_thresh = min(int(p * (2 ** 32)), 2 ** 32 - 1)
        kernel = functools.partial(_pe_add_dropout_prng_kernel,
                                   keep_thresh=keep_thresh, scale=scale)
        seed_arr = jnp.array([seed], dtype=jnp.int32)
        out = pl.pallas_call(
            kernel,
            out_shape=out_struct,
            grid=grid,
            in_specs=[x_spec, pe_spec,
                      pl.BlockSpec(memory_space=pltpu.MemorySpace.SMEM)],
            out_specs=x_spec,
            compiler_params=cparams,
        )(x_in, pe_in, seed_arr)
    else:
        # Non-TPU backend (CPU / interpret): pltpu.prng_* has no lowering there,
        # so stream precomputed uniforms (same inverted-dropout semantics).
        u = jax.random.uniform(jax.random.PRNGKey(seed), x_in.shape, dtype=jnp.float32)
        kernel = functools.partial(_pe_add_dropout_uniform_kernel, p=p, scale=scale)
        out = pl.pallas_call(
            kernel,
            out_shape=out_struct,
            grid=grid,
            in_specs=[x_spec, pe_spec, x_spec],   # uniforms share x's block layout
            out_specs=x_spec,
            compiler_params=cparams,
        )(x_in, pe_in, u)
    return out.reshape(S, B, H)
    # TODO(synk): PyTorch's nn.Dropout RNG stream cannot be bit-reproduced; the
    # dropout mask realization also depends on the tile size (per-tile seeding).


# ----------------------------------------------------------------------------
# Demo / self-check
# ----------------------------------------------------------------------------
if __name__ == "__main__":
    # --- flat path (small B, lane-ragged H): (S, B, H) = (8, 2, 32) ----------
    S, B, H = 8, 2, 32
    x = jax.random.normal(jax.random.PRNGKey(0), (S, B, H), dtype=jnp.float32)
    pe_table = make_positional_encoding_table(H, max_len=5000)
    ref = x + pe_table[:S]

    out = positional_encoding(x, pe_table, training=False)
    jax.block_until_ready(out)
    assert out.shape == (S, B, H) and out.dtype == x.dtype
    assert jnp.allclose(out, ref, atol=1e-6), "eval-mode mismatch (flat path)"

    # --- 3-D path (lane-dense H): (S, B, H) = (16, 8, 128) -------------------
    S2, B2, H2 = 16, 8, 128
    x2 = jax.random.normal(jax.random.PRNGKey(1), (S2, B2, H2), dtype=jnp.float32)
    pe_table2 = make_positional_encoding_table(H2, max_len=5000)
    out2 = positional_encoding(x2, pe_table2, training=False)
    jax.block_until_ready(out2)
    assert jnp.allclose(out2, x2 + pe_table2[:S2], atol=1e-6), "eval mismatch (3D path)"

    # --- bf16 input goes through the f32 compute path ------------------------
    xb = x2.astype(jnp.bfloat16)
    outb = positional_encoding(xb, pe_table2, training=False)
    jax.block_until_ready(outb)
    refb = (xb.astype(jnp.float32) + pe_table2[:S2]).astype(jnp.bfloat16)
    assert outb.dtype == jnp.bfloat16
    assert jnp.allclose(outb.astype(jnp.float32), refb.astype(jnp.float32),
                        atol=2e-2), "bf16 path mismatch"

    # --- training-mode smoke test: every element is 0 or (x+pe)/(1-p) --------
    p = 0.1
    out_t = positional_encoding(x, pe_table, p=p, training=True, seed=1234)
    jax.block_until_ready(out_t)
    scaled_ref = ref / (1.0 - p)
    ok = (out_t == 0) | jnp.isclose(out_t, scaled_ref, atol=1e-5, rtol=1e-5)
    assert bool(jnp.all(ok)), "training-mode dropout output has unexpected values"
    drop_frac = float(jnp.mean((out_t == 0).astype(jnp.float32)))
    assert drop_frac < 0.5, f"drop fraction {drop_frac} implausible for p={p}"

    print("KERNEL_OK")
</pallas_src>

<mosaic_0001>
module attributes {stable_mosaic.version = 11 : i64} {
  func.func @_pe_add_kernel(%arg0: i32, %arg1: i32, %arg2: memref<8x64xf32, #tpu.memory_space<vmem>>, %arg3: memref<8x32xf32, #tpu.memory_space<vmem>>, %arg4: memref<8x64xf32, #tpu.memory_space<vmem>>) attributes {dimension_semantics = [#tpu.dimension_semantics<parallel>, #tpu.dimension_semantics<parallel>], iteration_bounds = array<i64: 1, 1>, scalar_prefetch = 0 : i64, scratch_operands = 0 : i64, tpu.core_type = #tpu.core_type<tc>, window_params = [{transform_indices = @transform_0, window_bounds = array<i64: 8, 64>}, {transform_indices = @transform_1, window_bounds = array<i64: 8, 32>}, {transform_indices = @transform_2, window_bounds = array<i64: 8, 64>}]} {
    %c0 = arith.constant 0 : index
    %c0_0 = arith.constant 0 : index
    %0 = vector.load %arg2[%c0, %c0_0] : memref<8x64xf32, #tpu.memory_space<vmem>>, vector<8x64xf32>
    %c0_1 = arith.constant 0 : index
    %c0_2 = arith.constant 0 : index
    %1 = vector.load %arg3[%c0_1, %c0_2] : memref<8x32xf32, #tpu.memory_space<vmem>>, vector<8x32xf32>
    %2 = tpu.concatenate %1, %1 in 1 : vector<8x32xf32>, vector<8x32xf32> -> vector<8x64xf32>
    %3 = arith.addf %0, %2 : vector<8x64xf32>
    %c0_3 = arith.constant 0 : index
    %c0_4 = arith.constant 0 : index
    %4 = vector.load %arg4[%c0_3, %c0_4] : memref<8x64xf32, #tpu.memory_space<vmem>>, vector<8x64xf32>
    tpu.vector_store %arg4[%c0_3, %c0_4], %3 {strides = array<i32>} : memref<8x64xf32, #tpu.memory_space<vmem>>, vector<8x64xf32>,
    return
  }
  func.func @transform_0(%arg0: i32, %arg1: i32) -> (i32, i32) {
    %c0_i32 = arith.constant 0 : i32
    %c0_i32_0 = arith.constant 0 : i32
    return %arg0, %c0_i32 : i32, i32
  }
  func.func @transform_1(%arg0: i32, %arg1: i32) -> (i32, i32) {
    %c0_i32 = arith.constant 0 : i32
    %c0_i32_0 = arith.constant 0 : i32
    return %arg0, %c0_i32 : i32, i32
  }
  func.func @transform_2(%arg0: i32, %arg1: i32) -> (i32, i32) {
    %c0_i32 = arith.constant 0 : i32
    %c0_i32_0 = arith.constant 0 : i32
    return %arg0, %c0_i32 : i32, i32
  }
}

</mosaic_0001>

<bundles_post_ra>
// kernel: tpu_custom_call.1
= control target key start
LH: loop header
LB: loop body
LE: loop exit
PB: predicated region body
PF: predicated region fallthrough
CT: control target
= control target key end

     0   :  { %7 = vsyncpa [#allocation3], 0  ;;  %s179_s0 = inlined_call_operand.hbm [shape: f32[8,64], index: 0, kind: input, shape index: {}]   ;;  %s180_s1 = inlined_call_operand.hbm [shape: f32[8,32], index: 1, kind: input, shape index: {}]   ;;  %s181_s2 = inlined_call_operand.hbm [shape: f32[8,64], index: 2, kind: output, shape index: {}]  }
   0x1   :  { %8 = vsyncpa [#allocation6], 0 }
   0x2   :  { %9 = vsyncpa [#allocation4], 0  ;;  %s15_s11 = sshll.u32 %s179_s0, 4  ;;  %s151_s12 = smov [#allocation2]   ;;  %s16_s11 = int_to_ptr.hbm [resolvable:$true] %s15_s11 }
   0x3   :  { %s17_s13 = sshll.u32 %s151_s12, 4  ;;  %s26_s16 = sshll.u32 %s180_s1, 4  ;;  %s18_s13 = int_to_ptr.vmem [resolvable:$true] %s17_s13  ;;  %s27_s16 = int_to_ptr.hbm [resolvable:$true] %s26_s16 }
   0x4   :  { %20 = dma.hbm_to_vmem [thread:$0]  %s16_s11, 128, %s18_s13, [#allocation3]  }
   0x5   :  { %s152_s17 = smov [#allocation5]  }
   0x6   :  { %s28_s18 = sshll.u32 %s152_s17, 4  ;;  %s29_s18 = int_to_ptr.vmem [resolvable:$true] %s28_s18 }
   0x7   :  { %31 = dma.hbm_to_vmem [thread:$0]  %s27_s16, 128, %s29_s18, [#allocation6]  }
   0x8   :  { %145 = dma.done.wait [#allocation3], 128  }
   0x9   :  { %146 = vsyncadd [#allocation3], 4294967168 }
   0xa   :  { %147 = dma.done.wait [#allocation6], 128  }
   0xb   :  { %148 = vsyncadd [#allocation6], 4294967168  ;;  %v41_v0 = vld [vmem:[#allocation5] sm:$0xff]  ;;  %s153_s0 = smov 32   ;;  %vm46_vm0 = vcmask 261120   ;;  %v40_v1 = vld [vmem:[#allocation2] sm:$0xff] }
   0xc   :  { %43 = vrot.lane.b32.xlu0 %v41_v0, %s153_s0  ;;  %s154_s19 = smov [#allocation7]   ;;  %s58_s1 = sshll.u32 %s181_s2, 4  ;;  %vm49_vm1 = vcmask 523264   ;;  %s59_s1 = int_to_ptr.hbm [resolvable:$true] %s58_s1 }
   0xd   :  { %s56_s20 = sshll.u32 %s154_s19, 4  ;;  %s57_s20 = int_to_ptr.vmem [resolvable:$true] %s56_s20 }
  0x7e   :  { %v44_v2 = vpop.permute.xlu0 %43 }
  0x7f   :  { %v47_v3 = vsel %vm46_vm0, %v41_v0, %v44_v2 }
  0x80   :  { %v48_v4 = vadd.f32 %v47_v3, %v40_v1 }
  0x82   :  { %50 = vst.msk [vmem:[#allocation7] sm:$0xff] %vm49_vm1, %v48_v4 }
  0x83   :  { %61 = dma.vmem_to_hbm [thread:$0]  %s57_s20, 128, %s59_s1, [#allocation4]  }
  0x84   :  { %149 = dma.done.wait [#allocation4], 128  }
  0x85   :  { %150 = vsyncadd [#allocation4], 4294967168 }
  0x86   :  { %66 = vsyncpa [#allocation3], 1 }
  0x87   :  { %67 = vsyncpa [#allocation6], 1 }
  0x88   :  { %68 = vsyncpa [#allocation4], 1 }

</bundles_post_ra>
